<compile_context>
chip_gen: v6e
topology: v6e:2x2x1
jax: 0.10.0
libtpu: 0.0.40
codegen_flags: <defaults>
</compile_context>

<pallas_src>
import functools
import math

import jax
import jax.numpy as jnp
from jax.experimental import pallas as pl
from jax.experimental.pallas import tpu as pltpu


def _mhsa_kernel(xq_ref, xkv_ref, wq_ref, wk_ref, wv_ref,
                 bq_ref, bk_ref, bv_ref, wproj_ref, bproj_ref, mask_ref,
                 o_ref, acc_ref, *, scale):
    h = pl.program_id(2)

    @pl.when(h == 0)
    def _init():
        acc_ref[...] = jnp.zeros_like(acc_ref)

    cdt = xq_ref.dtype                       # MXU operand dtype (f32 or bf16)
    xq = xq_ref[0]                           # (tq, C)
    xkv = xkv_ref[0]                         # (T,  C)

    # ---- per-head QKV projection: 2-D MXU matmuls, K = C, f32 accumulation --
    q = jnp.dot(xq, wq_ref[0], preferred_element_type=jnp.float32) + bq_ref[0]   # (tq, Dh)
    k = jnp.dot(xkv, wk_ref[0], preferred_element_type=jnp.float32) + bk_ref[0]  # (T, Dh)
    v = jnp.dot(xkv, wv_ref[0], preferred_element_type=jnp.float32) + bv_ref[0]  # (T, Dh)

    # Fold 1/sqrt(Dh) into q (cheaper than scaling the (tq, T) score tile).
    q = (q * scale).astype(cdt)
    k = k.astype(cdt)

    # ---- scores: contraction over Dh with K stored (T, Dh) -> no transpose --
    att = jnp.einsum("td,sd->ts", q, k,
                     preferred_element_type=jnp.float32)           # (tq, T) f32
    att = att + mask_ref[...]                                       # precomputed causal bias

    # ---- numerically-stable softmax, exact normalization, all f32 -----------
    m = jnp.max(att, axis=-1, keepdims=True)
    e = jnp.exp(att - m)
    p = e / jnp.sum(e, axis=-1, keepdims=True)

    # ---- P @ V, then this head's slice of the output projection -------------
    head_out = jnp.dot(p.astype(cdt), v.astype(cdt),
                       preferred_element_type=jnp.float32)          # (tq, Dh)
    acc_ref[...] += jnp.dot(head_out.astype(cdt), wproj_ref[0],
                            preferred_element_type=jnp.float32)     # (tq, C)

    @pl.when(h == pl.num_programs(2) - 1)
    def _finalize():
        o_ref[0] = (acc_ref[...] + bproj_ref[...]).astype(o_ref.dtype)


def _prepare_params(wqkv, bqkv, wproj, bproj, n_heads, compute_dtype):
    """Re-arrange nn.Linear-style weights into head-major layouts (once)."""
    C = wqkv.shape[0]
    H = n_heads
    Dh = C // H

    def w_head_major(w):                              # (C, C) -> (H, C, Dh)
        return jnp.transpose(w.reshape(C, H, Dh), (1, 0, 2)).astype(compute_dtype)

    def b_head_major(b):                              # (C,)  -> (H, 1, Dh), f32
        return b.reshape(H, Dh)[:, None, :].astype(jnp.float32)

    wq, wk, wv = wqkv[:, :C], wqkv[:, C:2 * C], wqkv[:, 2 * C:]
    bq, bk, bv = bqkv[:C], bqkv[C:2 * C], bqkv[2 * C:]
    return (w_head_major(wq), w_head_major(wk), w_head_major(wv),
            b_head_major(bq), b_head_major(bk), b_head_major(bv),
            wproj.reshape(H, Dh, C).astype(compute_dtype),
            bproj.reshape(1, C).astype(jnp.float32))


def _causal_bias(T):
    row = jnp.arange(T)[:, None]
    col = jnp.arange(T)[None, :]
    # Large finite negative instead of -inf: robust even for fully-masked rows.
    return jnp.where(row >= col, 0.0, -1e30).astype(jnp.float32)


def _choose_q_tile(T):
    # Single query tile for short sequences; otherwise tile the query axis so
    # the per-step (tq, T) score tile and (tq, C) output slab stay small.
    if T <= 1024:
        return T
    for tq in (512, 256, 128, 64, 32, 16, 8):
        if T % tq == 0:
            return tq
    return T


def _vmem_cap_bytes():
    # Cap the scoped-VMEM request by the chip's VMEM capacity (~64 MiB v7x,
    # 128 MiB v5e/v6e) with 25% headroom; conservative fallback if unknown.
    try:
        cap = pltpu.get_tpu_info().vmem_capacity_bytes
        if cap:
            return int(cap) * 3 // 4
    except Exception:
        pass
    return 48 * 2 ** 20


def mhsa_pallas(x, wqkv, bqkv, wproj, bproj, n_heads, *,
                compute_dtype=jnp.float32):
    B, T, C = x.shape
    H = n_heads
    assert C % H == 0
    Dh = C // H

    tq = _choose_q_tile(T)
    nq = T // tq

    (wq, wk, wv, bq, bk, bv, wproj_h, bproj_2d) = _prepare_params(
        wqkv, bqkv, wproj, bproj, H, compute_dtype)
    mask_bias = _causal_bias(T)
    xc = x.astype(compute_dtype)

    kernel = functools.partial(_mhsa_kernel, scale=1.0 / math.sqrt(Dh))

    # ---- VMEM budget from the true live set (pipelined buffers + scratch +
    # in-kernel temporaries), 2x slack, clamped to the chip capacity. ---------
    cbytes = jnp.dtype(compute_dtype).itemsize
    obytes = jnp.dtype(x.dtype).itemsize
    f32 = 4
    blocks = ((tq * C + T * C + 3 * C * Dh + Dh * C) * cbytes
              + (3 * Dh + C) * f32 + tq * T * f32)                 # per-step input blocks
    live = (2 * blocks + 2 * tq * C * obytes                       # double-buffered I/O
            + tq * C * f32                                         # accumulator scratch
            + (3 * tq * T + 2 * T * Dh + 2 * tq * Dh + tq * C) * f32   # f32 temporaries
            + (tq * T + 2 * T * Dh + 2 * tq * Dh) * cbytes)            # low-precision copies
    vmem_limit = int(min(_vmem_cap_bytes(), max(2 * live, 16 * 2 ** 20)))

    return pl.pallas_call(
        kernel,
        out_shape=jax.ShapeDtypeStruct((B, T, C), x.dtype),
        grid_spec=pltpu.PrefetchScalarGridSpec(
            num_scalar_prefetch=0,
            grid=(B, nq, H),
            in_specs=[
                pl.BlockSpec((1, tq, C), lambda b, qi, h: (b, qi, 0)),   # x (query tile)
                pl.BlockSpec((1, T, C), lambda b, qi, h: (b, 0, 0)),     # x (keys/values)
                pl.BlockSpec((1, C, Dh), lambda b, qi, h: (h, 0, 0)),    # Wq (head-major)
                pl.BlockSpec((1, C, Dh), lambda b, qi, h: (h, 0, 0)),    # Wk
                pl.BlockSpec((1, C, Dh), lambda b, qi, h: (h, 0, 0)),    # Wv
                pl.BlockSpec((1, 1, Dh), lambda b, qi, h: (h, 0, 0)),    # bq
                pl.BlockSpec((1, 1, Dh), lambda b, qi, h: (h, 0, 0)),    # bk
                pl.BlockSpec((1, 1, Dh), lambda b, qi, h: (h, 0, 0)),    # bv
                pl.BlockSpec((1, Dh, C), lambda b, qi, h: (h, 0, 0)),    # Wproj (head-major)
                pl.BlockSpec((1, C), lambda b, qi, h: (0, 0)),           # bproj
                pl.BlockSpec((tq, T), lambda b, qi, h: (qi, 0)),         # causal bias
            ],
            out_specs=pl.BlockSpec((1, tq, C), lambda b, qi, h: (b, qi, 0)),
            scratch_shapes=[pltpu.VMEM((tq, C), jnp.float32)],
        ),
        compiler_params=pltpu.CompilerParams(
            dimension_semantics=("parallel", "parallel", "arbitrary"),
            vmem_limit_bytes=vmem_limit),
    )(xc, xc, wq, wk, wv, bq, bk, bv, wproj_h, bproj_2d, mask_bias)


def mhsa_reference(x, wqkv, bqkv, wproj, bproj, n_heads):
    """Pure-JAX reference mirroring the PyTorch forward pass."""
    B, T, C = x.shape
    H = n_heads
    Dh = C // H
    qkv = x @ wqkv + bqkv                                             # (B, T, 3C)
    qkv = qkv.reshape(B, T, 3, H, Dh).transpose(2, 0, 3, 1, 4)        # (3, B, H, T, Dh)
    q, k, v = qkv[0], qkv[1], qkv[2]
    att = jnp.einsum("bhtd,bhsd->bhts", q, k) / math.sqrt(Dh)
    mask = jnp.tril(jnp.ones((T, T), dtype=bool))
    att = jnp.where(mask[None, None], att, -jnp.inf)
    att = jax.nn.softmax(att, axis=-1)
    out = jnp.einsum("bhts,bhsd->bhtd", att, v)                       # (B, H, T, Dh)
    out = out.transpose(0, 2, 1, 3).reshape(B, T, C)
    return out @ wproj + bproj


if __name__ == "__main__":
    # Small, module-consistent shapes.
    B, T = 2, 8
    dim, n_heads, block_size = 32, 4, 16
    assert dim % n_heads == 0 and T <= block_size

    key = jax.random.PRNGKey(0)
    kx, k1, k2, k3, k4 = jax.random.split(key, 5)

    # Deterministic parameter init (uniform +-1/sqrt(fan_in), like nn.Linear).
    bound = 1.0 / math.sqrt(dim)
    # NOTE: stored as (in_features, out_features), i.e. transposed vs torch.
    wqkv = jax.random.uniform(k1, (dim, 3 * dim), jnp.float32, -bound, bound)
    bqkv = jax.random.uniform(k2, (3 * dim,), jnp.float32, -bound, bound)
    wproj = jax.random.uniform(k3, (dim, dim), jnp.float32, -bound, bound)
    bproj = jax.random.uniform(k4, (dim,), jnp.float32, -bound, bound)
    x = jax.random.normal(kx, (B, T, dim), jnp.float32)

    ref = mhsa_reference(x, wqkv, bqkv, wproj, bproj, n_heads)

    # f32 MXU operands (exact path): tight tolerance.
    out = jax.block_until_ready(
        mhsa_pallas(x, wqkv, bqkv, wproj, bproj, n_heads,
                    compute_dtype=jnp.float32))
    assert out.shape == (B, T, dim)
    assert jnp.allclose(out, ref, atol=1e-4, rtol=1e-4), "f32 mismatch vs reference"

    # bf16 MXU operands (v6e/v7x fast path): f32 accumulation/softmax.
    out_bf16 = jax.block_until_ready(
        mhsa_pallas(x, wqkv, bqkv, wproj, bproj, n_heads,
                    compute_dtype=jnp.bfloat16))
    assert out_bf16.dtype == x.dtype
    assert jnp.allclose(out_bf16, ref, atol=3e-2, rtol=3e-2), "bf16 mismatch vs reference"

    print("KERNEL_OK")
</pallas_src>

<mosaic_0001>
module attributes {stable_mosaic.version = 11 : i64} {
  func.func @_mhsa_kernel(%arg0: i32, %arg1: i32, %arg2: i32, %arg3: memref<1x8x32xf32, #tpu.memory_space<vmem>>, %arg4: memref<1x8x32xf32, #tpu.memory_space<vmem>>, %arg5: memref<1x32x8xf32, #tpu.memory_space<vmem>>, %arg6: memref<1x32x8xf32, #tpu.memory_space<vmem>>, %arg7: memref<1x32x8xf32, #tpu.memory_space<vmem>>, %arg8: memref<1x1x8xf32, #tpu.memory_space<vmem>>, %arg9: memref<1x1x8xf32, #tpu.memory_space<vmem>>, %arg10: memref<1x1x8xf32, #tpu.memory_space<vmem>>, %arg11: memref<1x8x32xf32, #tpu.memory_space<vmem>>, %arg12: memref<1x32xf32, #tpu.memory_space<vmem>>, %arg13: memref<8x8xf32, #tpu.memory_space<vmem>>, %arg14: memref<1x8x32xf32, #tpu.memory_space<vmem>>, %arg15: memref<8x32xf32, #tpu.memory_space<vmem>>) attributes {dimension_semantics = [#tpu.dimension_semantics<parallel>, #tpu.dimension_semantics<parallel>, #tpu.dimension_semantics<arbitrary>], iteration_bounds = array<i64: 2, 1, 4>, scalar_prefetch = 0 : i64, scratch_operands = 1 : i64, tpu.core_type = #tpu.core_type<tc>, window_params = [{transform_indices = @transform_0, window_bounds = array<i64: 1, 8, 32>}, {transform_indices = @transform_1, window_bounds = array<i64: 1, 8, 32>}, {transform_indices = @transform_2, window_bounds = array<i64: 1, 32, 8>}, {transform_indices = @transform_3, window_bounds = array<i64: 1, 32, 8>}, {transform_indices = @transform_4, window_bounds = array<i64: 1, 32, 8>}, {transform_indices = @transform_5, window_bounds = array<i64: 1, 1, 8>}, {transform_indices = @transform_6, window_bounds = array<i64: 1, 1, 8>}, {transform_indices = @transform_7, window_bounds = array<i64: 1, 1, 8>}, {transform_indices = @transform_8, window_bounds = array<i64: 1, 8, 32>}, {pipeline_mode = #tpu.pipeline_mode<synchronous>, transform_indices = @transform_9, window_bounds = array<i64: 1, 32>}, {transform_indices = @transform_10, window_bounds = array<i64: 8, 8>}, {transform_indices = @transform_11, window_bounds = array<i64: 1, 8, 32>}]} {
    %c0_i32 = arith.constant 0 : i32
    %0 = arith.cmpi eq, %arg2, %c0_i32 : i32
    %1 = arith.extui %0 : i1 to i32
    %c0_i32_0 = arith.constant 0 : i32
    %2 = arith.cmpi ne, %1, %c0_i32_0 : i32
    scf.if %2 {
      %cst_42 = arith.constant 0.000000e+00 : f32
      %52 = vector.broadcast %cst_42 : f32 to vector<8x32xf32>
      %c0_43 = arith.constant 0 : index
      %c0_44 = arith.constant 0 : index
      %53 = vector.load %arg15[%c0_43, %c0_44] : memref<8x32xf32, #tpu.memory_space<vmem>>, vector<8x32xf32>
      tpu.vector_store %arg15[%c0_43, %c0_44], %52 {strides = array<i32>} : memref<8x32xf32, #tpu.memory_space<vmem>>, vector<8x32xf32>,
    } else {
    }
    %c0 = arith.constant 0 : index
    %c0_1 = arith.constant 0 : index
    %c0_2 = arith.constant 0 : index
    %3 = vector.load %arg3[%c0, %c0_1, %c0_2] : memref<1x8x32xf32, #tpu.memory_space<vmem>>, vector<1x8x32xf32>
    %4 = vector.shape_cast %3 : vector<1x8x32xf32> to vector<8x32xf32>
    %c0_3 = arith.constant 0 : index
    %c0_4 = arith.constant 0 : index
    %c0_5 = arith.constant 0 : index
    %5 = vector.load %arg4[%c0_3, %c0_4, %c0_5] : memref<1x8x32xf32, #tpu.memory_space<vmem>>, vector<1x8x32xf32>
    %6 = vector.shape_cast %5 : vector<1x8x32xf32> to vector<8x32xf32>
    %c0_6 = arith.constant 0 : index
    %c0_7 = arith.constant 0 : index
    %c0_8 = arith.constant 0 : index
    %7 = vector.load %arg5[%c0_6, %c0_7, %c0_8] : memref<1x32x8xf32, #tpu.memory_space<vmem>>, vector<1x32x8xf32>
    %8 = vector.shape_cast %7 : vector<1x32x8xf32> to vector<32x8xf32>
    %cst = arith.constant dense<0.000000e+00> : vector<8x8xf32>
    %9 = tpu.matmul %4, %8, %cst {dimension_numbers = #tpu.dot_dimension_numbers<[1], [0], [0], [1], [0, 0, 1, 1], [], []>} : vector<8x32xf32>, vector<32x8xf32>, vector<8x8xf32> -> vector<8x8xf32>
    %c0_9 = arith.constant 0 : index
    %c0_10 = arith.constant 0 : index
    %c0_11 = arith.constant 0 : index
    %10 = vector.load %arg8[%c0_9, %c0_10, %c0_11] : memref<1x1x8xf32, #tpu.memory_space<vmem>>, vector<1x1x8xf32>
    %11 = vector.shape_cast %10 : vector<1x1x8xf32> to vector<1x8xf32>
    %12 = vector.broadcast %11 : vector<1x8xf32> to vector<8x8xf32>
    %13 = arith.addf %9, %12 : vector<8x8xf32>
    %c0_12 = arith.constant 0 : index
    %c0_13 = arith.constant 0 : index
    %c0_14 = arith.constant 0 : index
    %14 = vector.load %arg6[%c0_12, %c0_13, %c0_14] : memref<1x32x8xf32, #tpu.memory_space<vmem>>, vector<1x32x8xf32>
    %15 = vector.shape_cast %14 : vector<1x32x8xf32> to vector<32x8xf32>
    %cst_15 = arith.constant dense<0.000000e+00> : vector<8x8xf32>
    %16 = tpu.matmul %6, %15, %cst_15 {dimension_numbers = #tpu.dot_dimension_numbers<[1], [0], [0], [1], [0, 0, 1, 1], [], []>} : vector<8x32xf32>, vector<32x8xf32>, vector<8x8xf32> -> vector<8x8xf32>
    %c0_16 = arith.constant 0 : index
    %c0_17 = arith.constant 0 : index
    %c0_18 = arith.constant 0 : index
    %17 = vector.load %arg9[%c0_16, %c0_17, %c0_18] : memref<1x1x8xf32, #tpu.memory_space<vmem>>, vector<1x1x8xf32>
    %18 = vector.shape_cast %17 : vector<1x1x8xf32> to vector<1x8xf32>
    %19 = vector.broadcast %18 : vector<1x8xf32> to vector<8x8xf32>
    %20 = arith.addf %16, %19 : vector<8x8xf32>
    %c0_19 = arith.constant 0 : index
    %c0_20 = arith.constant 0 : index
    %c0_21 = arith.constant 0 : index
    %21 = vector.load %arg7[%c0_19, %c0_20, %c0_21] : memref<1x32x8xf32, #tpu.memory_space<vmem>>, vector<1x32x8xf32>
    %22 = vector.shape_cast %21 : vector<1x32x8xf32> to vector<32x8xf32>
    %cst_22 = arith.constant dense<0.000000e+00> : vector<8x8xf32>
    %23 = tpu.matmul %6, %22, %cst_22 {dimension_numbers = #tpu.dot_dimension_numbers<[1], [0], [0], [1], [0, 0, 1, 1], [], []>} : vector<8x32xf32>, vector<32x8xf32>, vector<8x8xf32> -> vector<8x8xf32>
    %c0_23 = arith.constant 0 : index
    %c0_24 = arith.constant 0 : index
    %c0_25 = arith.constant 0 : index
    %24 = vector.load %arg10[%c0_23, %c0_24, %c0_25] : memref<1x1x8xf32, #tpu.memory_space<vmem>>, vector<1x1x8xf32>
    %25 = vector.shape_cast %24 : vector<1x1x8xf32> to vector<1x8xf32>
    %26 = vector.broadcast %25 : vector<1x8xf32> to vector<8x8xf32>
    %27 = arith.addf %23, %26 : vector<8x8xf32>
    %cst_26 = arith.constant 0.353553385 : f32
    %28 = vector.broadcast %cst_26 : f32 to vector<8x8xf32>
    %29 = arith.mulf %13, %28 : vector<8x8xf32>
    "tpu.trace_start"() <{level = 10 : i32, message = "td,sd->ts"}> : () -> ()
    %cst_27 = arith.constant dense<0.000000e+00> : vector<8x8xf32>
    %30 = tpu.matmul %29, %20, %cst_27 {dimension_numbers = #tpu.dot_dimension_numbers<[1], [1], [0], [0], [0, 0, 1, 0], [], []>} : vector<8x8xf32>, vector<8x8xf32>, vector<8x8xf32> -> vector<8x8xf32>
    "tpu.trace_stop"() : () -> ()
    %c0_28 = arith.constant 0 : index
    %c0_29 = arith.constant 0 : index
    %31 = vector.load %arg13[%c0_28, %c0_29] : memref<8x8xf32, #tpu.memory_space<vmem>>, vector<8x8xf32>
    %32 = arith.addf %30, %31 : vector<8x8xf32>
    %cst_30 = arith.constant dense<0xFF800000> : vector<8xf32>
    %33 = vector.multi_reduction <maximumf>, %32, %cst_30 [1] : vector<8x8xf32> to vector<8xf32>
    %34 = vector.shape_cast %33 : vector<8xf32> to vector<8x1xf32>
    %35 = vector.broadcast %34 : vector<8x1xf32> to vector<8x8xf32>
    %36 = arith.subf %32, %35 : vector<8x8xf32>
    %37 = math.exp %36 : vector<8x8xf32>
    %cst_31 = arith.constant dense<0.000000e+00> : vector<8xf32>
    %38 = vector.multi_reduction <add>, %37, %cst_31 [1] : vector<8x8xf32> to vector<8xf32>
    %39 = vector.shape_cast %38 : vector<8xf32> to vector<8x1xf32>
    %40 = vector.broadcast %39 : vector<8x1xf32> to vector<8x8xf32>
    %41 = arith.divf %37, %40 : vector<8x8xf32>
    %cst_32 = arith.constant dense<0.000000e+00> : vector<8x8xf32>
    %42 = tpu.matmul %41, %27, %cst_32 {dimension_numbers = #tpu.dot_dimension_numbers<[1], [0], [0], [1], [0, 0, 1, 1], [], []>} : vector<8x8xf32>, vector<8x8xf32>, vector<8x8xf32> -> vector<8x8xf32>
    %c0_33 = arith.constant 0 : index
    %c0_34 = arith.constant 0 : index
    %43 = vector.load %arg15[%c0_33, %c0_34] : memref<8x32xf32, #tpu.memory_space<vmem>>, vector<8x32xf32>
    %c0_35 = arith.constant 0 : index
    %c0_36 = arith.constant 0 : index
    %c0_37 = arith.constant 0 : index
    %44 = vector.load %arg11[%c0_35, %c0_36, %c0_37] : memref<1x8x32xf32, #tpu.memory_space<vmem>>, vector<1x8x32xf32>
    %45 = vector.shape_cast %44 : vector<1x8x32xf32> to vector<8x32xf32>
    %cst_38 = arith.constant dense<0.000000e+00> : vector<8x32xf32>
    %46 = tpu.matmul %42, %45, %cst_38 {dimension_numbers = #tpu.dot_dimension_numbers<[1], [0], [0], [1], [0, 0, 1, 1], [], []>} : vector<8x8xf32>, vector<8x32xf32>, vector<8x32xf32> -> vector<8x32xf32>
    %47 = arith.addf %43, %46 : vector<8x32xf32>
    %c0_39 = arith.constant 0 : index
    %c0_40 = arith.constant 0 : index
    %48 = vector.load %arg15[%c0_39, %c0_40] : memref<8x32xf32, #tpu.memory_space<vmem>>, vector<8x32xf32>
    tpu.vector_store %arg15[%c0_39, %c0_40], %47 {strides = array<i32>} : memref<8x32xf32, #tpu.memory_space<vmem>>, vector<8x32xf32>,
    %c3_i32 = arith.constant 3 : i32
    %49 = arith.cmpi eq, %arg2, %c3_i32 : i32
    %50 = arith.extui %49 : i1 to i32
    %c0_i32_41 = arith.constant 0 : i32
    %51 = arith.cmpi ne, %50, %c0_i32_41 : i32
    scf.if %51 {
      %c0_42 = arith.constant 0 : index
      %c0_43 = arith.constant 0 : index
      %52 = vector.load %arg15[%c0_42, %c0_43] : memref<8x32xf32, #tpu.memory_space<vmem>>, vector<8x32xf32>
      %c0_44 = arith.constant 0 : index
      %c0_45 = arith.constant 0 : index
      %53 = vector.load %arg12[%c0_44, %c0_45] : memref<1x32xf32, #tpu.memory_space<vmem>>, vector<1x32xf32>
      %54 = vector.broadcast %53 : vector<1x32xf32> to vector<8x32xf32>
      %55 = arith.addf %52, %54 : vector<8x32xf32>
      %c0_46 = arith.constant 0 : index
      %c0_47 = arith.constant 0 : index
      %c0_48 = arith.constant 0 : index
      %56 = vector.load %arg14[%c0_46, %c0_47, %c0_48] : memref<1x8x32xf32, #tpu.memory_space<vmem>>, vector<1x8x32xf32>
      %57 = vector.shape_cast %56 : vector<1x8x32xf32> to vector<8x32xf32>
      %58 = vector.shape_cast %55 : vector<8x32xf32> to vector<1x8x32xf32>
      tpu.vector_store %arg14[%c0_46, %c0_47, %c0_48], %58 {strides = array<i32>} : memref<1x8x32xf32, #tpu.memory_space<vmem>>, vector<1x8x32xf32>,
    } else {
    }
    return
  }
  func.func @transform_0(%arg0: i32, %arg1: i32, %arg2: i32) -> (i32, i32, i32) {
    %c0_i32 = arith.constant 0 : i32
    %c0_i32_0 = arith.constant 0 : i32
    return %arg0, %arg1, %c0_i32 : i32, i32, i32
  }
  func.func @transform_1(%arg0: i32, %arg1: i32, %arg2: i32) -> (i32, i32, i32) {
    %c0_i32 = arith.constant 0 : i32
    %c0_i32_0 = arith.constant 0 : i32
    %c0_i32_1 = arith.constant 0 : i32
    return %arg0, %c0_i32, %c0_i32_0 : i32, i32, i32
  }
  func.func @transform_2(%arg0: i32, %arg1: i32, %arg2: i32) -> (i32, i32, i32) {
    %c0_i32 = arith.constant 0 : i32
    %c0_i32_0 = arith.constant 0 : i32
    %c0_i32_1 = arith.constant 0 : i32
    return %arg2, %c0_i32, %c0_i32_0 : i32, i32, i32
  }
  func.func @transform_3(%arg0: i32, %arg1: i32, %arg2: i32) -> (i32, i32, i32) {
    %c0_i32 = arith.constant 0 : i32
    %c0_i32_0 = arith.constant 0 : i32
    %c0_i32_1 = arith.constant 0 : i32
    return %arg2, %c0_i32, %c0_i32_0 : i32, i32, i32
  }
  func.func @transform_4(%arg0: i32, %arg1: i32, %arg2: i32) -> (i32, i32, i32) {
    %c0_i32 = arith.constant 0 : i32
    %c0_i32_0 = arith.constant 0 : i32
    %c0_i32_1 = arith.constant 0 : i32
    return %arg2, %c0_i32, %c0_i32_0 : i32, i32, i32
  }
  func.func @transform_5(%arg0: i32, %arg1: i32, %arg2: i32) -> (i32, i32, i32) {
    %c0_i32 = arith.constant 0 : i32
    %c0_i32_0 = arith.constant 0 : i32
    %c0_i32_1 = arith.constant 0 : i32
    return %arg2, %c0_i32, %c0_i32_0 : i32, i32, i32
  }
  func.func @transform_6(%arg0: i32, %arg1: i32, %arg2: i32) -> (i32, i32, i32) {
    %c0_i32 = arith.constant 0 : i32
    %c0_i32_0 = arith.constant 0 : i32
    %c0_i32_1 = arith.constant 0 : i32
    return %arg2, %c0_i32, %c0_i32_0 : i32, i32, i32
  }
  func.func @transform_7(%arg0: i32, %arg1: i32, %arg2: i32) -> (i32, i32, i32) {
    %c0_i32 = arith.constant 0 : i32
    %c0_i32_0 = arith.constant 0 : i32
    %c0_i32_1 = arith.constant 0 : i32
    return %arg2, %c0_i32, %c0_i32_0 : i32, i32, i32
  }
  func.func @transform_8(%arg0: i32, %arg1: i32, %arg2: i32) -> (i32, i32, i32) {
    %c0_i32 = arith.constant 0 : i32
    %c0_i32_0 = arith.constant 0 : i32
    %c0_i32_1 = arith.constant 0 : i32
    return %arg2, %c0_i32, %c0_i32_0 : i32, i32, i32
  }
  func.func @transform_9(%arg0: i32, %arg1: i32, %arg2: i32) -> (i32, i32) {
    %c0_i32 = arith.constant 0 : i32
    %c0_i32_0 = arith.constant 0 : i32
    %c0_i32_1 = arith.constant 0 : i32
    return %c0_i32, %c0_i32_0 : i32, i32
  }
  func.func @transform_10(%arg0: i32, %arg1: i32, %arg2: i32) -> (i32, i32) {
    %c0_i32 = arith.constant 0 : i32
    %c0_i32_0 = arith.constant 0 : i32
    return %arg1, %c0_i32 : i32, i32
  }
  func.func @transform_11(%arg0: i32, %arg1: i32, %arg2: i32) -> (i32, i32, i32) {
    %c0_i32 = arith.constant 0 : i32
    %c0_i32_0 = arith.constant 0 : i32
    return %arg0, %arg1, %c0_i32 : i32, i32, i32
  }
}

</mosaic_0001>

<bundles_post_ra>
// kernel: tpu_custom_call.1
= control target key start
LH: loop header
LB: loop body
LE: loop exit
PB: predicated region body
PF: predicated region fallthrough
CT: control target
= control target key end

     0   :  { %s1844_s0 = inlined_call_operand.vmem [shape: f32[2,8,32], index: 0, kind: input, shape index: {}]   ;;  %s1845_s1 = inlined_call_operand.vmem [shape: f32[2,8,32], index: 1, kind: input, shape index: {}]   ;;  %s1846_s2 = inlined_call_operand.vmem [shape: f32[4,32,8], index: 2, kind: input, shape index: {}]   ;;  %s1847_s3 = inlined_call_operand.vmem [shape: f32[4,32,8], index: 3, kind: input, shape index: {}]   ;;  %s1848_s4 = inlined_call_operand.vmem [shape: f32[4,32,8], index: 4, kind: input, shape index: {}]   ;;  %s1849_s5 = inlined_call_operand.vmem [shape: f32[4,1,8], index: 5, kind: input, shape index: {}]   ;;  %s1850_s6 = inlined_call_operand.vmem [shape: f32[4,1,8], index: 6, kind: input, shape index: {}]   ;;  %s1851_s7 = inlined_call_operand.vmem [shape: f32[4,1,8], index: 7, kind: input, shape index: {}]   ;;  %s1852_s8 = inlined_call_operand.vmem [shape: f32[4,8,32], index: 8, kind: input, shape index: {}]   ;;  %s1853_s9 = inlined_call_operand.vmem [shape: f32[1,32], index: 9, kind: input, shape index: {}]   ;;  %s1854_s10 = inlined_call_operand.vmem [shape: f32[8,8], index: 10, kind: input, shape index: {}]   ;;  %s1855_s11 = inlined_call_operand.hbm [shape: f32[2,8,32], index: 11, kind: output, shape index: {}]  }
   0x1   :  { %1869 = sst [smem:[#allocation17_spill]] %s1844_s0 }
   0x2   :  { %1870 = sst [smem:[#allocation18_spill]] %s1845_s1 }
   0x3   :  { %1871 = sst [smem:[#allocation19_spill]] %s1846_s2 }
   0x4   :  { %1872 = sst [smem:[#allocation20_spill]] %s1855_s11 }
   0x5   :  { %16 = vsyncpa [#allocation4], 0 }
   0x6   :  { %18 = vsyncpa [#allocation4 + $0x1], 0  ;;  %s1614_s17 = smov 0   ;;  %s1616_s18 = smov 0  }
   0x7   :  { %s1618_s19 = smov 0   ;;  %s1620_s20 = smov 0  }
   0x8   :  { %s1622_s21 = smov 0   ;;  %s1624_s22 = smov 0  }
   0x9   :  { %s1626_s23 = smov 0   ;;  %s1628_s24 = smov 0  }
   0xa LB: > { %1873 = sst [smem:[#allocation6_spill]] %s1520_s17  ;;  %s1273_s25 = sadd.s32 4294967295, %s1548_s24   ;;  %s1548_s24 = sphi %s1628_s24, %s24_s24   ;;  %s1544_s23 = sphi %s1626_s23, %s1904_s23   ;;  %s1540_s22 = sphi %s1624_s22, %s1903_s22   ;;  %s1536_s21 = sphi %s1622_s21, %s1902_s21   ;;  %s1532_s20 = sphi %s1620_s20, %s1901_s20   ;;  %s1528_s19 = sphi %s1618_s19, %s1900_s19   ;;  %s1524_s18 = sphi %s1616_s18, %s1899_s18   ;;  %s1520_s17 = sphi %s1614_s17, %s1898_s17  }
   0xb   : > { %1874 = sst [smem:[#allocation7_spill]] %s1524_s18  ;;  %s1274_s26 = sadd.s32 4294967294, %s1548_s24  }
   0xc   : > { %1875 = sst [smem:[#allocation8_spill]] %s1528_s19  ;;  %s36_s27 = sadd.s32 1, %s1540_s22 }
   0xd   : > { %1876 = sst [smem:[#allocation9_spill]] %s1540_s22  ;;  %p37_p0 = scmp.ge.s32.totalorder %s36_s27, 4 }
   0xe   : > { %1877 = sst [smem:[#allocation10_spill]] %s1544_s23  ;;  %s43_s28 = sadd.s32 1, %s1544_s23 }
   0xf   : > { %1878 = sst [smem:[#allocation11_spill]] %s1548_s24  ;;  %p345_p1 = scmp.ne.s32.totalorder %s1528_s19, %s1524_s18 }
  0x10   : > { %p346_p2 = scmp.eq.s32.totalorder %s1273_s25, 7  ;;  %s1906_s27 = smov (%p37_p0, %s36_s27), 0 }
  0x11   : > { %1879 = sst [smem:[#allocation12_spill]] %s1906_s27  ;;  %s1908_s28 = smov (!%p37_p0, %s43_s28), %s1544_s23 }
  0x12   : > { %p1663_p3 = por %p346_p2, %p345_p1  ;;  %p351_p4 = scmp.ne.s32.totalorder %s1524_s18, %s1520_s17 }
  0x13   : > { %p45_p5 = scmp.ge.s32.totalorder %s1908_s28, 2  ;;  %p352_p6 = scmp.eq.s32.totalorder %s1274_s26, 7 }
  0x14   : > { %s1880_s29 = scalar_select %p1663_p3, 1, 0 }
  0x15   : > { %p1278_p7 = scmp.ge.s32.totalorder %s1548_s24, 1  ;;  %p446_p8 = scmp.lt.s32.totalorder %s1548_s24, 9 }
  0x16   : > { %1881 = sst [smem:[#allocation13_spill]] %s1880_s29  ;;  %s1910_s28 = smov (%p45_p5, %s1908_s28), 0 }
  0x17   : > { %1882 = sst [smem:[#allocation14_spill]] %s1910_s28  ;;  %p1673_p9 = por %p352_p6, %p351_p4 }
  0x18   : > { %p447_p10 = pnand %p1278_p7, %p446_p8  ;;  %s330_s12 = ssub.s32 %s1544_s23, %s1910_s28 }
  0x19   : > { %s1883_s30 = scalar_select %p1673_p9, 1, 0 }
  0x1a   : > { %s335_s13 = sadd.s32 1, %s1528_s19  ;;  %p333_p11 = scmp.eq.s32.totalorder %s330_s12, 0 }
  0x1b   : > { %1884 = sst [smem:[#allocation15_spill]] %s1883_s30  ;;  %450 = sbr.rel (%p447_p10) target bundleno = 1188 (0x4a4), region = 64 }
  0x1c   : > { %s1681_s14 = scalar_select %p333_p11, %s1528_s19, %s335_s13  }
  0x1d   : > { %s1859_s15 = sand.u32 (!%p447_p10), 1, %s1524_s18   ;;  %p524_p12 = scmp.lt.s32.totalorder (!%p447_p10), %s1536_s21, 1 }
  0x1e   : > { %1885 = sst [smem:[#allocation16_spill]] %s1681_s14  ;;  %s1687_s16 = sshll.u32 (!%p447_p10), %s1859_s15, 3 }
  0x1f   : > { %p535_p13 = scmp.lt.s32.totalorder (!%p447_p10), %s1532_s20, 3  ;;  %s1886_s0 = sld [smem:[#allocation17_spill]] (!%p447_p10) }
  0x20   : > { %s525_s25 = scalar_select %p524_p12, %s1536_s21, 1 }
  0x21   : > { %s1692_s26 = scalar_select %p535_p13, %s1532_s20, 3 }
  0x22   : > { %s1280_s12 = sshll.u32 %s525_s25, 3  ;;  %s1887_s1 = sld [smem:[#allocation18_spill]] }
  0x23   : > { %s1306_s14 = sshll.u32 %s1692_s26, 5  ;;  %s1888_s2 = sld [smem:[#allocation19_spill]] }
  0x24   : > { %s1717_s28 = scalar_lea.vmem %s1847_s3, %s1306_s14  ;;  %s1722_s22 = scalar_lea.vmem %s1848_s4, %s1306_s14 }
  0x25   : > { %s1697_s27 = scalar_lea.vmem %s1886_s0, %s1280_s12  ;;  %s555_s19 = scalar_lea.vmem %s1850_s6, %s1692_s26 }
  0x26   : > { %s558_s11 = scalar_lea.vmem %s1851_s7, %s1692_s26  ;;  %s1288_s24 = sshll.u32 %s1692_s26, 3 }
  0x27   : > { %s1736_s18 = scalar_lea.vmem %s1852_s8, %s1288_s24  ;;  %s523_s25 = scalar_lea.vmem [#allocation3], %s1687_s16 }
  0x28   : > { %s1702_s15 = scalar_lea.vmem %s1887_s1, %s1280_s12  ;;  %p1289_p0 = scmp.ne.s32.totalorder %s1532_s20, 0 }
  0x29   : > { %s1712_s29 = scalar_lea.vmem %s1888_s2, %s1306_s14 }
  0x2a   : > { %570 = sbr.rel (%p1289_p0) target bundleno = 49 (0x31), region = 68 }
  0x2f   : > { %vm571_vm0 = vcmask 261120   ;;  %v1550_v0 = vmov 0.0  }
  0x30   : > { %572 = vst.msk [vmem:[#allocation2] sm:$0xff] %vm571_vm0, %v1550_v0 }
  0x31 PF: > { %v578_v1 = vld [vmem:[%s1712_s29 + $0x18] sm:$0xff]  ;;  %v1551_v3 = vmov 0.0   ;;  %v577_v4 = vld [vmem:[%s1712_s29 + $0x10] sm:$0xff]  ;;  %v576_v6 = vld [vmem:[%s1712_s29 + $0x8] sm:$0xff]  ;;  %vm586_vm1 = vcmask 261120   ;;  %vm1552_vm2 = vmmov 0   ;;  %s1889_s2 = scalar_lea.vmem %s1849_s5, %s1692_s26 }
  0x32   : > { %v663_v2 = vld [vmem:[%s1717_s28 + $0x18] sm:$0xff]  ;;  %1330 = vmatprep.subr.mxu0 %v1551_v3  ;;  %1341 = vmatprep.subr.mxu1 %v1551_v3  ;;  %v662_v5 = vld [vmem:[%s1717_s28 + $0x10] sm:$0xff]  ;;  %v661_v7 = vld [vmem:[%s1717_s28 + $0x8] sm:$0xff]  ;;  %vm827_vm3 = vcmask 64512   ;;  %p1300_p1 = scmp.ne.s32.totalorder %s1532_s20, 3 }
  0x33   : > { %1331 = vmatpush3.msra.mxu0 %v578_v1  ;;  %1342 = vmatpush3.msra.mxu1 %v663_v2  ;;  %v575_v8 = vld [vmem:[%s1712_s29] sm:$0xff]  ;;  %v747_v21 = vld [vmem:[%s1722_s22 + $0x18] sm:$0xff]  ;;  %v746_v22 = vld [vmem:[%s1722_s22 + $0x10] sm:$0xff] }
  0x34   : > { %1332 = vmatprep.subr.mxu0 %v1551_v3  ;;  %1343 = vmatprep.subr.mxu1 %v1551_v3  ;;  %v660_v9 = vld [vmem:[%s1717_s28] sm:$0xff]  ;;  %v745_v23 = vld [vmem:[%s1722_s22 + $0x8] sm:$0xff] }
  0x35   : > { %1333 = vmatpush3.msra.mxu0 %v577_v4  ;;  %1344 = vmatpush3.msra.mxu1 %v662_v5  ;;  %v573_v10 = vld [vmem:[%s1697_s27] sm:$0xff] }
  0x36   : > { %1334 = vmatprep.subr.mxu0 %v1551_v3  ;;  %1345 = vmatprep.subr.mxu1 %v1551_v3  ;;  %v574_v11 = vld [vmem:[%s1702_s15] sm:$0xff] }
  0x37   : > { %1335 = vmatpush3.msra.mxu0 %v576_v6  ;;  %1346 = vmatpush3.msra.mxu1 %v661_v7  ;;  %v1290_v12 = vld [vmem:[%s1889_s2] ss:$0 sm:$0xff] }
  0x38   : > { %1336 = vmatprep.subr.mxu0 %v1551_v3  ;;  %1347 = vmatprep.subr.mxu1 %v1551_v3  ;;  %v1292_v13 = vld [vmem:[%s555_s19] ss:$0 sm:$0xff] }
  0x39   : > { %1337 = vmatpush3.msra.mxu0 %v575_v8  ;;  %1338 = vmatprep.mubr.msk.f32.mxu0 %vm1552_vm2, %v1551_v3  ;;  %v744_v24 = vld [vmem:[%s1722_s22] sm:$0xff] }
  0x3a   : > { %1348 = vmatpush3.msra.mxu1 %v660_v9  ;;  %1349 = vmatprep.mubr.msk.f32.mxu1 %vm1552_vm2, %v1551_v3  ;;  %v826_v25 = vld [vmem:[%s1854_s10] sm:$0xff] }
  0x3b   : > { %1339 = vmatmul.mubr.msk.f32.vlgmr.msra.gmra.mxu0 %vm586_vm1, %v573_v10  ;;  %1350 = vmatmul.mubr.msk.f32.vlgmr.msra.gmra.mxu1 %vm586_vm1, %v574_v11  ;;  %v1294_v35 = vld [vmem:[%s558_s11] ss:$0 sm:$0xff] }
  0x3c   : > { %1363 = vmatprep.subr.mxu1 %v1551_v3  ;;  %1365 = vmatprep.mubr.msk.f32.mxu1 %vm1552_vm2, %v1551_v3  ;;  %v989_v39 = vld [vmem:[%s1736_s18] sm:$0xff] }
  0x3d   : > { %1352 = vmatprep.subr.mxu0 %v1551_v3  ;;  %1360 = vmatprep.mubr.msk.f32.mxu0 %vm1552_vm2, %v1551_v3  ;;  %v988_v45 = vld [vmem:[#allocation2] sm:$0xff] }
  0x3e   : > { %1353 = vmatpush3.msra.mxu0 %v747_v21 }
  0x3f   : > { %1354 = vmatprep.subr.mxu0 %v1551_v3 }
  0x40   : > { %1355 = vmatpush3.msra.mxu0 %v746_v22 }
  0x41   : > { %1356 = vmatprep.subr.mxu0 %v1551_v3 }
  0x42   : > { %1357 = vmatpush3.msra.mxu0 %v745_v23 }
  0x43   : > { %1358 = vmatprep.subr.mxu0 %v1551_v3 }
  0x44   : > { %1359 = vmatpush3.msra.mxu0 %v744_v24 }
  0x45   : > { %1361 = vmatmul.mubr.msk.f32.vlgmr.msra.gmra.mxu0 %vm586_vm1, %v574_v11  ;;  %1373 = vmatprep.subr.mxu0 %v1551_v3 }
  0x46   : > { %1375 = vmatprep.mubr.msk.f32.mxu0 %vm1552_vm2, %v1551_v3  ;;  %1374 = vmatpush3.msra.mxu0 %v989_v39 }
  0xfb   : > { %v656_v14 = vpop.f32.mrf.mxu0  ;;  %v740_v15 = vpop.f32.mrf.mxu1 }
  0xfc   : > { %v657_v16 = vadd.f32 %v1290_v12, %v656_v14  ;;  %v741_v17 = vadd.f32 %v1292_v13, %v740_v15 }
  0xfd   : > { %v1340_v18 = vpop.f32.mrf.mxu0  ;;  %v1351_v19 = vpop.f32.mrf.mxu1 }
  0xfe   : > { %v825_v20 = vmul.f32 0.35355338, %v657_v16  ;;  %1364 = vmatpush3.xpose.msk.msra.mxu1 %vm827_vm3, %v741_v17 }
  0xff   : > { %1368 = vmatprep.subr.mxu1 %v1551_v3 }
 0x101   : > { %1366 = vmatmul.mubr.msk.f32.vlgmr.msra.gmra.mxu1 %vm827_vm3, %v825_v20 }
 0x102   : > { %1370 = vmatprep.mubr.msk.f32.mxu1 %vm1552_vm2, %v1551_v3 }
 0x105   : > { %v821_v36 = vpop.f32.mrf.mxu0 }
 0x106   : > { %v822_v37 = vadd.f32 %v1294_v35, %v821_v36 }
 0x107   : > { %v1362_v38 = vpop.f32.mrf.mxu0 }
 0x108   : > { %1369 = vmatpush3.msra.mxu1 %v822_v37 }
 0x1c1   : > { %v900_v26 = vpop.f32.mrf.mxu1 }
 0x1c2   : > { %v901_v27 = vadd.f32 %v900_v26, %v826_v25 }
 0x1c3   : > { %v1367_v28 = vpop.f32.mrf.mxu1 }
 0x1c4   : > { %v904_v29 = vsel %vm827_vm3, %v901_v27, -inf }
 0x1c5   : > { %905 = vmax.xlane.f32.xlu0 %v904_v29 }
 0x24e   : > { %v906_v30 = vpop.xlane.xlu0 %905 }
 0x24f   : > { %v907_v31 = vsub.f32 %v901_v27, %v906_v30 }
 0x251   : > { %v908_v32 = vmul.f32 1.442695, %v907_v31 }
 0x253   : > { %1452 = vpow2.f32 %v908_v32 }
 0x260   : > { %v1453_v33 = vpop.eup %1452 }
 0x261   : > { %v910_v34 = vsel %vm827_vm3, %v1453_v33, 0.0 }
 0x262   : > { %911 = vadd.xlane.f32.xlu0 %v910_v34 }
 0x2eb   : > { %v912_v40 = vpop.xlane.xlu0 %911 }
 0x2ec   : > { %1454 = vrcp.f32 %v912_v40 }
 0x2f9   : > { %v1455_v41 = vpop.eup %1454 }
 0x2fa   : > { %v914_v42 = vmul.f32 %v1455_v41, %v1453_v33 }
 0x2fc   : > { %1371 = vmatmul.mubr.msk.f32.vlgmr.msra.gmra.mxu1 %vm827_vm3, %v914_v42 }
 0x3bc   : > { %v984_v43 = vpop.f32.mrf.mxu1 }
 0x3bd   : > { %1376 = vmatmul.mubr.msk.f32.vlgmr.msra.gmra.mxu0 %vm827_vm3, %v984_v43 }
 0x3be   : > { %v1372_v44 = vpop.f32.mrf.mxu1 }
 0x47c   : > { %1068 = sbr.rel (%p1300_p1) target bundleno = 1163 (0x48b), region = 72 }
 0x47d   : > { %v1059_v46 = vpop.f32.mrf.mxu0 }
 0x47e   : > { %v1063_v47 = vadd.f32 %v1059_v46, %v988_v45 }
 0x47f   : > { %v1377_v48 = vpop.f32.mrf.mxu0 }
 0x480   : > { %1064 = vst.msk [vmem:[#allocation2] sm:$0xff] %vm586_vm1, %v1063_v47 }
 0x481   : > { %v1301_v50 = vld [vmem:[%s1853_s9] ss:$0 sm:$0xff] }
 0x487   : > { %v1069_v49 = vld [vmem:[#allocation2] sm:$0xff] }
 0x488   : > { %v1077_v51 = vadd.f32 %v1301_v50, %v1069_v49 }
 0x48a   : > { %1078 = vst.msk [vmem:[%s523_s25] sm:$0xff] %vm586_vm1, %v1077_v51 }
 0x48b PF: > { %s1890_s22 = sld [smem:[#allocation7_spill]]  ;;  %s1303_s12 = sshll.u32 %s1536_s21, 7 }
 0x48c   : > { %s1892_s20 = sld [smem:[#allocation20_spill]]  ;;  %s1094_s18 = sshll.u32 %s523_s25, 4  ;;  %s1095_s18 = int_to_ptr.vmem [resolvable:$true] %s1094_s18 }
 0x48d   : > { %s1456_s2 = scalar_lea.vmem %s1095_s18, 128  ;;  %s1553_s17 = smov [#allocation3]  }
 0x48e   : > { %p1457_p2 = scmp.ne.s32.totalorder %s1095_s18, %s1456_s2  ;;  %s1460_s27 = sshll.u32 %s1553_s17, 4  ;;  %s1461_s27 = int_to_ptr.vmem [resolvable:$false] %s1460_s27 }
 0x48f   : > { %s1462_s29 = scalar_lea.vmem %s1461_s27, 256  ;;  %p1463_p6 = scmp.lt.s32.totalorder %s1095_s18, %s1461_s27 }
 0x490   : > { %p1458_p4 = pnand %p1457_p2, %p1663_p3  ;;  %p1464_p7 = scmp.lt.s32.totalorder %s1462_s29, %s1456_s2 }
 0x491   : > { %s1894_s0 = sand.u32 1, %s1890_s22  }
 0x492   : > { %s1893_s11 = smov %s1892_s20  ;;  %s1092_s24 = scalar_lea.hbm %s1892_s20, %s1303_s12 }
 0x493   : > { %s1080_s1 = scalar_lea.sflag [#allocation4], %s1894_s0  ;;  %p1459_p5 = pneg %p1458_p4 }
 0x494   : > { %p1465_p8 = por %p1464_p7, %p1463_p6 }
 0x496   : > { %p1466_p10 = pnand %p1465_p8, %p1459_p5 }
 0x498   : > { %1469 = shalt.err (!%p1466_p10)
}
 0x499   : > { %s1470_s21 = scalar_lea.hbm %s1092_s24, 128  ;;  %s1474_s14 = scalar_lea.hbm %s1893_s11, 256 }
 0x49a   : > { %p1471_p11 = scmp.ne.s32.totalorder %s1092_s24, %s1470_s21  ;;  %p1475_p0 = scmp.lt.s32.totalorder %s1092_s24, %s1893_s11 }
 0x49b   : > { %p1476_p1 = scmp.lt.s32.totalorder %s1474_s14, %s1470_s21 }
 0x49c   : > { %p1472_p12 = pnand %p1471_p11, %p1663_p3 }
 0x49d   : > { %p1477_p2 = por %p1476_p1, %p1475_p0 }
 0x49e   : > { %p1473_p13 = pneg %p1472_p12 }
 0x4a0   : > { %p1478_p4 = pnand %p1477_p2, %p1473_p13 }
 0x4a2   : > { %1481 = shalt.err (!%p1478_p4)
}
 0x4a3   : > { %1378 = dma.vmem_to_hbm [thread:$0]  (%p1663_p3), %s1095_s18, 128, %s1092_s24, %s1080_s1  }
 0x4a4 PF: > { %s1895_s26 = sld [smem:[#allocation11_spill]] }
 0x4a5   : > { %s1896_s13 = sld [smem:[#allocation6_spill]] }
 0x4aa   : > { %p1384_p5 = scmp.ge.s32.totalorder %s1895_s26, 2 }
 0x4ab   : > { %s1106_s12 = sand.u32 1, %s1896_s13  }
 0x4ac   : > { %p1381_p6 = pnand %p1384_p5, %p1673_p9  ;;  %s1107_s19 = scalar_lea.sflag [#allocation4], %s1106_s12 }
 0x4ae   : > { %p1382_p7 = pneg %p1381_p6 }
 0x4b0   : > { %1515 = dma.done.wait (%p1382_p7), %s1107_s19, 128  }
 0x4b1   : > { %1517 = vsyncadd (%p1382_p7), %s1107_s19, 4294967168  ;;  %s24_s24 = sadd.s32 1, %s1895_s26   ;;  %s1898_s17 = sld [smem:[#allocation7_spill]] }
 0x4b2   : > { %p21_p8 = scmp.ge.s32.totalorder %s24_s24, 10   ;;  %s1899_s18 = sld [smem:[#allocation8_spill]] }
 0x4b3   : > { %s1900_s19 = sld [smem:[#allocation16_spill]] }
 0x4b4   : > { %s1901_s20 = sld [smem:[#allocation9_spill]]  ;;  %23 = sbr.rel (!%p21_p8) target bundleno = 10 (0xa), region = 134 }
 0x4b5   : > { %s1902_s21 = sld [smem:[#allocation10_spill]] }
 0x4b6   : > { %s1903_s22 = sld [smem:[#allocation12_spill]] }
 0x4b7   : > { %s1904_s23 = sld [smem:[#allocation14_spill]] }
 0x4b9   :  { %1112 = vsyncpa [#allocation4], 1 }
 0x4ba   :  { %1114 = vsyncpa [#allocation4 + $0x1], 1 }

</bundles_post_ra>
